<compile_context>
chip_gen: v5e
topology: v5e:2x2
jax: 0.10.0
libtpu: 0.0.40
codegen_flags: <defaults>
</compile_context>

<pallas_src>
import functools
import math

import jax
import jax.numpy as jnp
from jax.experimental import pallas as pl
from jax.experimental.pallas import tpu as pltpu

_LANE = 128


def _round_up(x, m):
    return ((x + m - 1) // m) * m


def _vmem_full(shape):
    # No grid -> single invocation, full-array block resident in VMEM.
    return pl.BlockSpec(shape, lambda: (0,) * len(shape),
                        memory_space=pltpu.MemorySpace.VMEM)


# ----------------------------------------------------------------------------
# Fused kernel: num_layers LSTM cells (seq_len == 1) + linear head
# ----------------------------------------------------------------------------
def _fused_decoder_kernel(x_ref, h0_ref, c0_ref, w_ref, b_ref,
                          wlin_ref, blin_ref,
                          h_out_ref, c_out_ref, y_out_ref,
                          *, num_layers, hp, kp):
    """
    x_ref    : (B, Kp)                 f32, layer-0 input, lanes >= input_size are 0
    h0_ref   : (num_layers, B, Hp)     f32, lanes >= hidden are 0
    c0_ref   : (num_layers, B, Hp)     f32
    w_ref    : (num_layers, Kp+Hp, 4*Hp)  stacked [W_ih^T ; W_hh^T], gate-aligned cols
    b_ref    : (num_layers, 1, 4*Hp)   f32, combined b_ih + b_hh, gate-aligned
    wlin_ref : (Hp, Op)                linear W^T, zero-padded
    blin_ref : (1, Op)                 f32
    outputs  : h/c (num_layers, B, Hp), y (B, Op)  -- all lane-dense (128 mult.)
    Gate order matches PyTorch nn.LSTM: i, f, g, o.
    """
    inp = x_ref[...]                                   # (B, Kp)
    h_new = None
    for layer in range(num_layers):                    # unrolled (small, static)
        h_prev = h0_ref[layer]                         # (B, Hp)
        c_prev = c0_ref[layer]                         # (B, Hp)
        # Single fused matmul: [x | h] @ [W_ih^T ; W_hh^T]  (128-aligned concat)
        xh = jnp.concatenate([inp, h_prev], axis=-1)   # (B, Kp+Hp)
        gates = (jnp.dot(xh.astype(w_ref.dtype), w_ref[layer],
                         preferred_element_type=jnp.float32)
                 + b_ref[layer])                       # (B, 4*Hp), f32
        # 128-lane-aligned gate blocks -> plain vreg slices, no relayout.
        i_g = jax.nn.sigmoid(gates[:, 0 * hp:1 * hp])
        f_g = jax.nn.sigmoid(gates[:, 1 * hp:2 * hp])
        g_g = jnp.tanh(gates[:, 2 * hp:3 * hp])
        o_g = jax.nn.sigmoid(gates[:, 3 * hp:4 * hp])

        c_new = f_g * c_prev + i_g * g_g
        h_new = o_g * jnp.tanh(c_new)

        h_out_ref[layer, :, :] = h_new.astype(h_out_ref.dtype)
        c_out_ref[layer, :, :] = c_new.astype(c_out_ref.dtype)

        # Next layer's input (seq_len == 1, no inter-layer dropout).
        inp = h_new if kp == hp else jnp.pad(h_new, ((0, 0), (0, kp - hp)))

    # Linear head fused into the same kernel.
    y = (jnp.dot(h_new.astype(wlin_ref.dtype), wlin_ref[...],
                 preferred_element_type=jnp.float32)
         + blin_ref[...])
    y_out_ref[...] = y.astype(y_out_ref.dtype)


# ----------------------------------------------------------------------------
# Parameter init (PyTorch layout) + packing into the kernel's padded layout
# ----------------------------------------------------------------------------
def init_raw_params(key, input_size, hidden_size, num_layers=1):
    """PyTorch-style uniform(-1/sqrt(H), 1/sqrt(H)) init, PyTorch layouts."""
    bound = 1.0 / math.sqrt(hidden_size)
    raw = {"lstm": [], "linear": {}}
    for layer in range(num_layers):
        in_sz = input_size if layer == 0 else hidden_size
        key, k1, k2, k3, k4 = jax.random.split(key, 5)
        raw["lstm"].append({
            "w_ih": jax.random.uniform(k1, (4 * hidden_size, in_sz),
                                       jnp.float32, -bound, bound),
            "w_hh": jax.random.uniform(k2, (4 * hidden_size, hidden_size),
                                       jnp.float32, -bound, bound),
            "b_ih": jax.random.uniform(k3, (4 * hidden_size,),
                                       jnp.float32, -bound, bound),
            "b_hh": jax.random.uniform(k4, (4 * hidden_size,),
                                       jnp.float32, -bound, bound),
        })
    key, k1, k2 = jax.random.split(key, 3)
    raw["linear"] = {
        "w": jax.random.uniform(k1, (input_size, hidden_size),
                                jnp.float32, -bound, bound),
        "b": jax.random.uniform(k2, (input_size,), jnp.float32, -bound, bound),
    }
    return raw


def pack_decoder_params(raw, input_size, hidden_size, num_layers=1,
                        weight_dtype=jnp.float32):
    """Repack PyTorch-layout weights into the lane-aligned fused layout.

    weight_dtype=jnp.bfloat16 is recommended for v6e/v7x at realistic sizes
    (halves weight HBM bytes; f32 accumulation is kept via
    preferred_element_type). The demo keeps f32 for the tight reference check.
    """
    H = hidden_size
    hp = _round_up(hidden_size, _LANE)
    kp = _round_up(max(input_size, hidden_size), _LANE)
    op = _round_up(input_size, _LANE)

    w_all = jnp.zeros((num_layers, kp + hp, 4 * hp), jnp.float32)
    b_all = jnp.zeros((num_layers, 1, 4 * hp), jnp.float32)
    for layer in range(num_layers):
        lp = raw["lstm"][layer]
        in_sz = input_size if layer == 0 else hidden_size
        for gate in range(4):           # PyTorch gate order: i, f, g, o
            w_ih_g = lp["w_ih"][gate * H:(gate + 1) * H, :]     # (H, in_sz)
            w_hh_g = lp["w_hh"][gate * H:(gate + 1) * H, :]     # (H, H)
            b_g = (lp["b_ih"][gate * H:(gate + 1) * H]
                   + lp["b_hh"][gate * H:(gate + 1) * H])
            c0_, c1_ = gate * hp, gate * hp + H
            w_all = w_all.at[layer, 0:in_sz, c0_:c1_].set(w_ih_g.T)
            w_all = w_all.at[layer, kp:kp + H, c0_:c1_].set(w_hh_g.T)
            b_all = b_all.at[layer, 0, c0_:c1_].set(b_g)

    w_lin = jnp.zeros((hp, op), jnp.float32)
    w_lin = w_lin.at[:H, :input_size].set(raw["linear"]["w"].T)
    b_lin = jnp.zeros((1, op), jnp.float32)
    b_lin = b_lin.at[0, :input_size].set(raw["linear"]["b"])

    return {
        "w_all": w_all.astype(weight_dtype),
        "b_all": b_all,                         # biases stay f32
        "w_lin": w_lin.astype(weight_dtype),
        "b_lin": b_lin,
    }


# ----------------------------------------------------------------------------
# Forward (one fused pallas_call)
# ----------------------------------------------------------------------------
@functools.partial(jax.jit,
                   static_argnames=("input_size", "hidden_size", "num_layers"))
def lstm_decoder_forward(params, x_input, encoder_hidden_states, *,
                         input_size, hidden_size, num_layers=1):
    """
    x_input:               (batch, input_size)
    encoder_hidden_states: tuple (h0, c0), each (num_layers, batch, hidden)
    returns (output, (h_n, c_n)) with output (batch, input_size)
    """
    h0, c0 = encoder_hidden_states
    batch = x_input.shape[0]
    hp = _round_up(hidden_size, _LANE)
    kp = _round_up(max(input_size, hidden_size), _LANE)
    op = _round_up(input_size, _LANE)

    x_pad = jnp.pad(x_input.astype(jnp.float32),
                    ((0, 0), (0, kp - input_size)))
    h0_pad = jnp.pad(h0.astype(jnp.float32),
                     ((0, 0), (0, 0), (0, hp - hidden_size)))
    c0_pad = jnp.pad(c0.astype(jnp.float32),
                     ((0, 0), (0, 0), (0, hp - hidden_size)))

    kernel = functools.partial(_fused_decoder_kernel,
                               num_layers=num_layers, hp=hp, kp=kp)

    h_out, c_out, y_out = pl.pallas_call(
        kernel,
        out_shape=(
            jax.ShapeDtypeStruct((num_layers, batch, hp), jnp.float32),
            jax.ShapeDtypeStruct((num_layers, batch, hp), jnp.float32),
            jax.ShapeDtypeStruct((batch, op), jnp.float32),
        ),
        in_specs=[
            _vmem_full((batch, kp)),
            _vmem_full((num_layers, batch, hp)),
            _vmem_full((num_layers, batch, hp)),
            _vmem_full(params["w_all"].shape),
            _vmem_full(params["b_all"].shape),
            _vmem_full(params["w_lin"].shape),
            _vmem_full(params["b_lin"].shape),
        ],
        out_specs=(
            _vmem_full((num_layers, batch, hp)),
            _vmem_full((num_layers, batch, hp)),
            _vmem_full((batch, op)),
        ),
    )(x_pad, h0_pad, c0_pad, params["w_all"], params["b_all"],
      params["w_lin"], params["b_lin"])

    # Strip lane padding back to the module's logical shapes.
    output = y_out[:, :input_size]
    h_n = h_out[..., :hidden_size]
    c_n = c_out[..., :hidden_size]
    return output, (h_n, c_n)


# ----------------------------------------------------------------------------
# Pure-JAX reference (PyTorch-layout weights) for the sanity check
# ----------------------------------------------------------------------------
def _reference_forward(raw, x_input, encoder_hidden_states, num_layers=1):
    h0, c0 = encoder_hidden_states
    H = h0.shape[-1]
    inp = x_input
    hs, cs = [], []
    for layer in range(num_layers):
        lp = raw["lstm"][layer]
        gates = (inp @ lp["w_ih"].T + h0[layer] @ lp["w_hh"].T
                 + lp["b_ih"][None, :] + lp["b_hh"][None, :])
        i = jax.nn.sigmoid(gates[:, 0 * H:1 * H])
        f = jax.nn.sigmoid(gates[:, 1 * H:2 * H])
        g = jnp.tanh(gates[:, 2 * H:3 * H])
        o = jax.nn.sigmoid(gates[:, 3 * H:4 * H])
        c = f * c0[layer] + i * g
        h = o * jnp.tanh(c)
        hs.append(h)
        cs.append(c)
        inp = h
    out = inp @ raw["linear"]["w"].T + raw["linear"]["b"][None, :]
    return out, (jnp.stack(hs, 0), jnp.stack(cs, 0))


if __name__ == "__main__":
    # Small shapes consistent with the module's forward contract.
    batch = 2
    input_size = 4       # number of trajectory features
    hidden_size = 32
    num_layers = 2       # exercise the fused multi-layer path

    key = jax.random.PRNGKey(0)
    key, kparam, kx, kh, kc = jax.random.split(key, 5)

    raw_params = init_raw_params(kparam, input_size, hidden_size, num_layers)
    packed_params = pack_decoder_params(raw_params, input_size, hidden_size,
                                        num_layers, weight_dtype=jnp.float32)

    x_input = jax.random.normal(kx, (batch, input_size), jnp.float32)
    h0 = jax.random.normal(kh, (num_layers, batch, hidden_size), jnp.float32)
    c0 = jax.random.normal(kc, (num_layers, batch, hidden_size), jnp.float32)

    output, (h_n, c_n) = lstm_decoder_forward(
        packed_params, x_input, (h0, c0),
        input_size=input_size, hidden_size=hidden_size, num_layers=num_layers)
    jax.block_until_ready((output, h_n, c_n))

    # Cross-check against pure-JAX reference (f32 everywhere).
    ref_out, (ref_h, ref_c) = _reference_forward(
        raw_params, x_input, (h0, c0), num_layers=num_layers)

    assert output.shape == (batch, input_size)
    assert h_n.shape == (num_layers, batch, hidden_size)
    assert c_n.shape == (num_layers, batch, hidden_size)
    assert jnp.allclose(output, ref_out, atol=1e-5, rtol=1e-5)
    assert jnp.allclose(h_n, ref_h, atol=1e-5, rtol=1e-5)
    assert jnp.allclose(c_n, ref_c, atol=1e-5, rtol=1e-5)

    print("KERNEL_OK")
</pallas_src>

<mosaic_0001>
module attributes {stable_mosaic.version = 11 : i64} {
  func.func @_fused_decoder_kernel(%arg0: memref<2x128xf32, #tpu.memory_space<vmem>>, %arg1: memref<2x2x128xf32, #tpu.memory_space<vmem>>, %arg2: memref<2x2x128xf32, #tpu.memory_space<vmem>>, %arg3: memref<2x256x512xf32, #tpu.memory_space<vmem>>, %arg4: memref<2x1x512xf32, #tpu.memory_space<vmem>>, %arg5: memref<128x128xf32, #tpu.memory_space<vmem>>, %arg6: memref<1x128xf32, #tpu.memory_space<vmem>>, %arg7: memref<2x2x128xf32, #tpu.memory_space<vmem>>, %arg8: memref<2x2x128xf32, #tpu.memory_space<vmem>>, %arg9: memref<2x128xf32, #tpu.memory_space<vmem>>) attributes {dimension_semantics = [], scalar_prefetch = 0 : i64, scratch_operands = 0 : i64, tpu.core_type = #tpu.core_type<tc>} {
    %c0 = arith.constant 0 : index
    %c0_0 = arith.constant 0 : index
    %0 = vector.load %arg0[%c0, %c0_0] : memref<2x128xf32, #tpu.memory_space<vmem>>, vector<2x128xf32>
    %c0_1 = arith.constant 0 : index
    %c0_2 = arith.constant 0 : index
    %c0_3 = arith.constant 0 : index
    %1 = vector.load %arg1[%c0_1, %c0_2, %c0_3] : memref<2x2x128xf32, #tpu.memory_space<vmem>>, vector<1x2x128xf32>
    %2 = vector.shape_cast %1 : vector<1x2x128xf32> to vector<2x128xf32>
    %c0_4 = arith.constant 0 : index
    %c0_5 = arith.constant 0 : index
    %c0_6 = arith.constant 0 : index
    %3 = vector.load %arg2[%c0_4, %c0_5, %c0_6] : memref<2x2x128xf32, #tpu.memory_space<vmem>>, vector<1x2x128xf32>
    %4 = vector.shape_cast %3 : vector<1x2x128xf32> to vector<2x128xf32>
    %5 = tpu.concatenate %0, %2 in 1 : vector<2x128xf32>, vector<2x128xf32> -> vector<2x256xf32>
    %c0_7 = arith.constant 0 : index
    %c0_8 = arith.constant 0 : index
    %c0_9 = arith.constant 0 : index
    %6 = vector.load %arg3[%c0_7, %c0_8, %c0_9] : memref<2x256x512xf32, #tpu.memory_space<vmem>>, vector<1x256x512xf32>
    %7 = vector.shape_cast %6 : vector<1x256x512xf32> to vector<256x512xf32>
    %cst = arith.constant dense<0.000000e+00> : vector<2x512xf32>
    %8 = tpu.matmul %5, %7, %cst {dimension_numbers = #tpu.dot_dimension_numbers<[1], [0], [0], [1], [0, 0, 1, 1], [], []>} : vector<2x256xf32>, vector<256x512xf32>, vector<2x512xf32> -> vector<2x512xf32>
    %c0_10 = arith.constant 0 : index
    %c0_11 = arith.constant 0 : index
    %c0_12 = arith.constant 0 : index
    %9 = vector.load %arg4[%c0_10, %c0_11, %c0_12] : memref<2x1x512xf32, #tpu.memory_space<vmem>>, vector<1x1x512xf32>
    %10 = vector.shape_cast %9 : vector<1x1x512xf32> to vector<1x512xf32>
    %11 = vector.broadcast %10 : vector<1x512xf32> to vector<2x512xf32>
    %12 = arith.addf %8, %11 : vector<2x512xf32>
    %13 = vector.extract_strided_slice %12 {offsets = [0, 0], sizes = [2, 128], strides = [1, 1]} : vector<2x512xf32> to vector<2x128xf32>
    %14 = arith.negf %13 : vector<2x128xf32>
    %15 = math.exp %14 : vector<2x128xf32>
    %cst_13 = arith.constant 1.000000e+00 : f32
    %16 = vector.broadcast %cst_13 : f32 to vector<2x128xf32>
    %17 = arith.addf %16, %15 : vector<2x128xf32>
    %18 = arith.divf %16, %17 : vector<2x128xf32>
    %19 = vector.extract_strided_slice %12 {offsets = [0, 128], sizes = [2, 128], strides = [1, 1]} : vector<2x512xf32> to vector<2x128xf32>
    %20 = arith.negf %19 : vector<2x128xf32>
    %21 = math.exp %20 : vector<2x128xf32>
    %cst_14 = arith.constant 1.000000e+00 : f32
    %22 = vector.broadcast %cst_14 : f32 to vector<2x128xf32>
    %23 = arith.addf %22, %21 : vector<2x128xf32>
    %24 = arith.divf %22, %23 : vector<2x128xf32>
    %25 = vector.extract_strided_slice %12 {offsets = [0, 256], sizes = [2, 128], strides = [1, 1]} : vector<2x512xf32> to vector<2x128xf32>
    %26 = math.tanh %25 : vector<2x128xf32>
    %27 = vector.extract_strided_slice %12 {offsets = [0, 384], sizes = [2, 128], strides = [1, 1]} : vector<2x512xf32> to vector<2x128xf32>
    %28 = arith.negf %27 : vector<2x128xf32>
    %29 = math.exp %28 : vector<2x128xf32>
    %cst_15 = arith.constant 1.000000e+00 : f32
    %30 = vector.broadcast %cst_15 : f32 to vector<2x128xf32>
    %31 = arith.addf %30, %29 : vector<2x128xf32>
    %32 = arith.divf %30, %31 : vector<2x128xf32>
    %33 = arith.mulf %24, %4 : vector<2x128xf32>
    %34 = arith.mulf %18, %26 : vector<2x128xf32>
    %35 = arith.addf %33, %34 : vector<2x128xf32>
    %36 = math.tanh %35 : vector<2x128xf32>
    %37 = arith.mulf %32, %36 : vector<2x128xf32>
    %c0_16 = arith.constant 0 : index
    %c0_17 = arith.constant 0 : index
    %c0_18 = arith.constant 0 : index
    %38 = vector.load %arg7[%c0_16, %c0_17, %c0_18] : memref<2x2x128xf32, #tpu.memory_space<vmem>>, vector<1x2x128xf32>
    %39 = vector.shape_cast %38 : vector<1x2x128xf32> to vector<2x128xf32>
    %40 = vector.shape_cast %37 : vector<2x128xf32> to vector<1x2x128xf32>
    tpu.vector_store %arg7[%c0_16, %c0_17, %c0_18], %40 {strides = array<i32>} : memref<2x2x128xf32, #tpu.memory_space<vmem>>, vector<1x2x128xf32>,
    %c0_19 = arith.constant 0 : index
    %c0_20 = arith.constant 0 : index
    %c0_21 = arith.constant 0 : index
    %41 = vector.load %arg8[%c0_19, %c0_20, %c0_21] : memref<2x2x128xf32, #tpu.memory_space<vmem>>, vector<1x2x128xf32>
    %42 = vector.shape_cast %41 : vector<1x2x128xf32> to vector<2x128xf32>
    %43 = vector.shape_cast %35 : vector<2x128xf32> to vector<1x2x128xf32>
    tpu.vector_store %arg8[%c0_19, %c0_20, %c0_21], %43 {strides = array<i32>} : memref<2x2x128xf32, #tpu.memory_space<vmem>>, vector<1x2x128xf32>,
    %c1 = arith.constant 1 : index
    %c0_22 = arith.constant 0 : index
    %c0_23 = arith.constant 0 : index
    %44 = vector.load %arg1[%c1, %c0_22, %c0_23] : memref<2x2x128xf32, #tpu.memory_space<vmem>>, vector<1x2x128xf32>
    %45 = vector.shape_cast %44 : vector<1x2x128xf32> to vector<2x128xf32>
    %c1_24 = arith.constant 1 : index
    %c0_25 = arith.constant 0 : index
    %c0_26 = arith.constant 0 : index
    %46 = vector.load %arg2[%c1_24, %c0_25, %c0_26] : memref<2x2x128xf32, #tpu.memory_space<vmem>>, vector<1x2x128xf32>
    %47 = vector.shape_cast %46 : vector<1x2x128xf32> to vector<2x128xf32>
    %48 = tpu.concatenate %37, %45 in 1 : vector<2x128xf32>, vector<2x128xf32> -> vector<2x256xf32>
    %c1_27 = arith.constant 1 : index
    %c0_28 = arith.constant 0 : index
    %c0_29 = arith.constant 0 : index
    %49 = vector.load %arg3[%c1_27, %c0_28, %c0_29] : memref<2x256x512xf32, #tpu.memory_space<vmem>>, vector<1x256x512xf32>
    %50 = vector.shape_cast %49 : vector<1x256x512xf32> to vector<256x512xf32>
    %cst_30 = arith.constant dense<0.000000e+00> : vector<2x512xf32>
    %51 = tpu.matmul %48, %50, %cst_30 {dimension_numbers = #tpu.dot_dimension_numbers<[1], [0], [0], [1], [0, 0, 1, 1], [], []>} : vector<2x256xf32>, vector<256x512xf32>, vector<2x512xf32> -> vector<2x512xf32>
    %c1_31 = arith.constant 1 : index
    %c0_32 = arith.constant 0 : index
    %c0_33 = arith.constant 0 : index
    %52 = vector.load %arg4[%c1_31, %c0_32, %c0_33] : memref<2x1x512xf32, #tpu.memory_space<vmem>>, vector<1x1x512xf32>
    %53 = vector.shape_cast %52 : vector<1x1x512xf32> to vector<1x512xf32>
    %54 = vector.broadcast %53 : vector<1x512xf32> to vector<2x512xf32>
    %55 = arith.addf %51, %54 : vector<2x512xf32>
    %56 = vector.extract_strided_slice %55 {offsets = [0, 0], sizes = [2, 128], strides = [1, 1]} : vector<2x512xf32> to vector<2x128xf32>
    %57 = arith.negf %56 : vector<2x128xf32>
    %58 = math.exp %57 : vector<2x128xf32>
    %cst_34 = arith.constant 1.000000e+00 : f32
    %59 = vector.broadcast %cst_34 : f32 to vector<2x128xf32>
    %60 = arith.addf %59, %58 : vector<2x128xf32>
    %61 = arith.divf %59, %60 : vector<2x128xf32>
    %62 = vector.extract_strided_slice %55 {offsets = [0, 128], sizes = [2, 128], strides = [1, 1]} : vector<2x512xf32> to vector<2x128xf32>
    %63 = arith.negf %62 : vector<2x128xf32>
    %64 = math.exp %63 : vector<2x128xf32>
    %cst_35 = arith.constant 1.000000e+00 : f32
    %65 = vector.broadcast %cst_35 : f32 to vector<2x128xf32>
    %66 = arith.addf %65, %64 : vector<2x128xf32>
    %67 = arith.divf %65, %66 : vector<2x128xf32>
    %68 = vector.extract_strided_slice %55 {offsets = [0, 256], sizes = [2, 128], strides = [1, 1]} : vector<2x512xf32> to vector<2x128xf32>
    %69 = math.tanh %68 : vector<2x128xf32>
    %70 = vector.extract_strided_slice %55 {offsets = [0, 384], sizes = [2, 128], strides = [1, 1]} : vector<2x512xf32> to vector<2x128xf32>
    %71 = arith.negf %70 : vector<2x128xf32>
    %72 = math.exp %71 : vector<2x128xf32>
    %cst_36 = arith.constant 1.000000e+00 : f32
    %73 = vector.broadcast %cst_36 : f32 to vector<2x128xf32>
    %74 = arith.addf %73, %72 : vector<2x128xf32>
    %75 = arith.divf %73, %74 : vector<2x128xf32>
    %76 = arith.mulf %67, %47 : vector<2x128xf32>
    %77 = arith.mulf %61, %69 : vector<2x128xf32>
    %78 = arith.addf %76, %77 : vector<2x128xf32>
    %79 = math.tanh %78 : vector<2x128xf32>
    %80 = arith.mulf %75, %79 : vector<2x128xf32>
    %c1_37 = arith.constant 1 : index
    %c0_38 = arith.constant 0 : index
    %c0_39 = arith.constant 0 : index
    %81 = vector.load %arg7[%c1_37, %c0_38, %c0_39] : memref<2x2x128xf32, #tpu.memory_space<vmem>>, vector<1x2x128xf32>
    %82 = vector.shape_cast %81 : vector<1x2x128xf32> to vector<2x128xf32>
    %83 = vector.shape_cast %80 : vector<2x128xf32> to vector<1x2x128xf32>
    tpu.vector_store %arg7[%c1_37, %c0_38, %c0_39], %83 {strides = array<i32>} : memref<2x2x128xf32, #tpu.memory_space<vmem>>, vector<1x2x128xf32>,
    %c1_40 = arith.constant 1 : index
    %c0_41 = arith.constant 0 : index
    %c0_42 = arith.constant 0 : index
    %84 = vector.load %arg8[%c1_40, %c0_41, %c0_42] : memref<2x2x128xf32, #tpu.memory_space<vmem>>, vector<1x2x128xf32>
    %85 = vector.shape_cast %84 : vector<1x2x128xf32> to vector<2x128xf32>
    %86 = vector.shape_cast %78 : vector<2x128xf32> to vector<1x2x128xf32>
    tpu.vector_store %arg8[%c1_40, %c0_41, %c0_42], %86 {strides = array<i32>} : memref<2x2x128xf32, #tpu.memory_space<vmem>>, vector<1x2x128xf32>,
    %c0_43 = arith.constant 0 : index
    %c0_44 = arith.constant 0 : index
    %87 = vector.load %arg5[%c0_43, %c0_44] : memref<128x128xf32, #tpu.memory_space<vmem>>, vector<128x128xf32>
    %cst_45 = arith.constant dense<0.000000e+00> : vector<2x128xf32>
    %88 = tpu.matmul %80, %87, %cst_45 {dimension_numbers = #tpu.dot_dimension_numbers<[1], [0], [0], [1], [0, 0, 1, 1], [], []>} : vector<2x128xf32>, vector<128x128xf32>, vector<2x128xf32> -> vector<2x128xf32>
    %c0_46 = arith.constant 0 : index
    %c0_47 = arith.constant 0 : index
    %89 = vector.load %arg6[%c0_46, %c0_47] : memref<1x128xf32, #tpu.memory_space<vmem>>, vector<1x128xf32>
    %90 = vector.broadcast %89 : vector<1x128xf32> to vector<2x128xf32>
    %91 = arith.addf %88, %90 : vector<2x128xf32>
    %c0_48 = arith.constant 0 : index
    %c0_49 = arith.constant 0 : index
    %92 = vector.load %arg9[%c0_48, %c0_49] : memref<2x128xf32, #tpu.memory_space<vmem>>, vector<2x128xf32>
    tpu.vector_store %arg9[%c0_48, %c0_49], %91 {strides = array<i32>} : memref<2x128xf32, #tpu.memory_space<vmem>>, vector<2x128xf32>,
    return
  }
}

</mosaic_0001>

<bundles_post_ra>
// kernel: lstm_decoder_forward.1
= control target key start
LH: loop header
LB: loop body
LE: loop exit
PB: predicated region body
PF: predicated region fallthrough
CT: control target
= control target key end

     0   :  { %15 = vsyncpa [#allocation3], 0  ;;  %s1256_s0 = inlined_call_operand.vmem [shape: f32[2,128], index: 0, kind: input, shape index: {}]   ;;  %s1257_s1 = inlined_call_operand.vmem [shape: f32[2,2,128], index: 1, kind: input, shape index: {}]   ;;  %s1258_s2 = inlined_call_operand.vmem [shape: f32[2,2,128], index: 2, kind: input, shape index: {}]   ;;  %s1259_s3 = inlined_call_operand.hbm [shape: f32[2,256,512], index: 3, kind: input, shape index: {}]   ;;  %s1260_s4 = inlined_call_operand.vmem [shape: f32[2,1,512], index: 4, kind: input, shape index: {}]   ;;  %s1261_s5 = inlined_call_operand.hbm [shape: f32[128,128], index: 5, kind: input, shape index: {}]   ;;  %s1262_s6 = inlined_call_operand.vmem [shape: f32[1,128], index: 6, kind: input, shape index: {}]   ;;  %s1263_s7 = inlined_call_operand.hbm [shape: f32[2,2,128], index: 7, kind: output, shape index: {0}]   ;;  %s1264_s8 = inlined_call_operand.hbm [shape: f32[2,2,128], index: 8, kind: output, shape index: {1}]   ;;  %s1265_s9 = inlined_call_operand.hbm [shape: f32[2,128], index: 9, kind: output, shape index: {2}]  }
   0x1   :  { %16 = vsyncpa [#allocation6], 0 }
   0x2   :  { %17 = vsyncpa [#allocation4], 0 }
   0x3   :  { %18 = vsyncpa [#allocation9], 0  ;;  %s29_s11 = sshll.u32 %s1259_s3, 4  ;;  %s1074_s12 = smov [#allocation2]   ;;  %s30_s11 = int_to_ptr.hbm [resolvable:$true] %s29_s11 }
   0x4   :  { %s31_s13 = sshll.u32 %s1074_s12, 4  ;;  %s44_s16 = sshll.u32 %s1261_s5, 4  ;;  %s32_s13 = int_to_ptr.vmem [resolvable:$true] %s31_s13  ;;  %s45_s16 = int_to_ptr.hbm [resolvable:$true] %s44_s16 }
   0x5   :  { %s1075_s17 = smov 512   ;;  %s1076_s18 = smov 32  }
   0x6   :  { %37 = dma.hbm_to_vmem [thread:$0]  %s30_s11, 32768, %s32_s13, [#allocation3], %s1075_s17, %s1075_s17, %s1076_s18  }
   0x7   :  { %s1077_s19 = smov [#allocation5]   ;;  %s1078_s21 = smov 128  }
   0x8   :  { %s46_s20 = sshll.u32 %s1077_s19, 4  ;;  %s1079_s22 = smov 8   ;;  %s47_s20 = int_to_ptr.vmem [resolvable:$true] %s46_s20 }
   0x9   :  { %52 = dma.hbm_to_vmem [thread:$0]  %s45_s16, 2048, %s47_s20, [#allocation6], %s1078_s21, %s1078_s21, %s1079_s22  }
   0xa   :  { %1066 = dma.done.wait [#allocation3], 32768  }
   0xb   :  { %1067 = vsyncadd [#allocation3], 4294934528 }
   0xc   :  { %1068 = dma.done.wait [#allocation6], 2048  }
   0xd   :  { %1069 = vsyncadd [#allocation6], 4294965248  ;;  %v127_v0 = vld [vmem:[#allocation2 + $0x1e8] sm:$0xff]  ;;  %v126_v3 = vld [vmem:[#allocation2 + $0x1e0] sm:$0xff]  ;;  %s860_s14 = sshll.u32 %s1264_s8, 4  ;;  %s1081_s15 = smov 2   ;;  %s861_s14 = int_to_ptr.hbm [resolvable:$true] %s860_s14 }
   0xe   :  { %v123_v1 = vld [vmem:[#allocation2 + $0x1c8] sm:$0xff]  ;;  %244 = vmatpush.msra.mxu2 %v127_v0  ;;  %204 = vmatpush.msra.mxu0 %v126_v3  ;;  %v122_v6 = vld [vmem:[#allocation2 + $0x1c0] sm:$0xff]  ;;  %v129_v61 = vld [vmem:[#allocation2 + $0x1f8] sm:$0xff]  ;;  %s1082_s16 = smov [#allocation7]   ;;  %s847_s21 = sshll.u32 %s1263_s7, 4  ;;  %s848_s21 = int_to_ptr.hbm [resolvable:$true] %s847_s21 }
   0xf   :  { %v191_v2 = vld [vmem:[#allocation2 + $0x3e8] sm:$0xff]  ;;  %v190_v7 = vld [vmem:[#allocation2 + $0x3e0] sm:$0xff]  ;;  %v193_v0 = vld [vmem:[#allocation2 + $0x3f8] sm:$0xff]  ;;  %s845_s17 = sshll.u32 %s1082_s16, 4  ;;  %s1083_s3 = smov [#allocation10]   ;;  %s846_s17 = int_to_ptr.vmem [resolvable:$true] %s845_s17 }
  0x10   :  { %264 = vmatpush.msra.mxu3 %v191_v2  ;;  %v187_v4 = vld [vmem:[#allocation2 + $0x3c8] sm:$0xff]  ;;  %245 = vmatpush.msra.mxu2 %v123_v1  ;;  %v118_v9 = vld [vmem:[#allocation2 + $0x1a0] sm:$0xff]  ;;  %v125_v1 = vld [vmem:[#allocation2 + $0x1d8] sm:$0xff]  ;;  %s872_s5 = sshll.u32 %s1083_s3, 4  ;;  %s873_s5 = int_to_ptr.vmem [resolvable:$true] %s872_s5 }
  0x11   :  { %v119_v5 = vld [vmem:[#allocation2 + $0x1a8] sm:$0xff]  ;;  %v186_v10 = vld [vmem:[#allocation2 + $0x3c0] sm:$0xff]  ;;  %205 = vmatpush.msra.mxu0 %v122_v6  ;;  %224 = vmatpush.msra.mxu1 %v190_v7  ;;  %v128_v2 = vld [vmem:[#allocation2 + $0x1f0] sm:$0xff] }
  0x12   :  { %265 = vmatpush.msra.mxu3 %v187_v4  ;;  %v183_v8 = vld [vmem:[#allocation2 + $0x3a8] sm:$0xff]  ;;  %246 = vmatpush.msra.mxu2 %v119_v5  ;;  %v114_v13 = vld [vmem:[#allocation2 + $0x180] sm:$0xff]  ;;  %v189_v4 = vld [vmem:[#allocation2 + $0x3d8] sm:$0xff] }
  0x13   :  { %v115_v11 = vld [vmem:[#allocation2 + $0x188] sm:$0xff]  ;;  %v182_v14 = vld [vmem:[#allocation2 + $0x3a0] sm:$0xff]  ;;  %206 = vmatpush.msra.mxu0 %v118_v9  ;;  %225 = vmatpush.msra.mxu1 %v186_v10  ;;  %v121_v5 = vld [vmem:[#allocation2 + $0x1b8] sm:$0xff] }
  0x14   :  { %v179_v12 = vld [vmem:[#allocation2 + $0x388] sm:$0xff]  ;;  %266 = vmatpush.msra.mxu3 %v183_v8  ;;  %247 = vmatpush.msra.mxu2 %v115_v11  ;;  %v110_v17 = vld [vmem:[#allocation2 + $0x160] sm:$0xff]  ;;  %v124_v6 = vld [vmem:[#allocation2 + $0x1d0] sm:$0xff] }
  0x15   :  { %v111_v15 = vld [vmem:[#allocation2 + $0x168] sm:$0xff]  ;;  %v178_v18 = vld [vmem:[#allocation2 + $0x380] sm:$0xff]  ;;  %207 = vmatpush.msra.mxu0 %v114_v13  ;;  %226 = vmatpush.msra.mxu1 %v182_v14  ;;  %v192_v7 = vld [vmem:[#allocation2 + $0x3f0] sm:$0xff] }
  0x16   :  { %v175_v16 = vld [vmem:[#allocation2 + $0x368] sm:$0xff]  ;;  %267 = vmatpush.msra.mxu3 %v179_v12  ;;  %248 = vmatpush.msra.mxu2 %v111_v15  ;;  %v106_v21 = vld [vmem:[#allocation2 + $0x140] sm:$0xff]  ;;  %v185_v8 = vld [vmem:[#allocation2 + $0x3b8] sm:$0xff] }
  0x17   :  { %v107_v19 = vld [vmem:[#allocation2 + $0x148] sm:$0xff]  ;;  %v174_v22 = vld [vmem:[#allocation2 + $0x360] sm:$0xff]  ;;  %208 = vmatpush.msra.mxu0 %v110_v17  ;;  %227 = vmatpush.msra.mxu1 %v178_v18  ;;  %v117_v9 = vld [vmem:[#allocation2 + $0x198] sm:$0xff] }
  0x18   :  { %v171_v20 = vld [vmem:[#allocation2 + $0x348] sm:$0xff]  ;;  %268 = vmatpush.msra.mxu3 %v175_v16  ;;  %249 = vmatpush.msra.mxu2 %v107_v19  ;;  %v102_v25 = vld [vmem:[#allocation2 + $0x120] sm:$0xff]  ;;  %v120_v10 = vld [vmem:[#allocation2 + $0x1b0] sm:$0xff] }
  0x19   :  { %v103_v23 = vld [vmem:[#allocation2 + $0x128] sm:$0xff]  ;;  %v170_v26 = vld [vmem:[#allocation2 + $0x340] sm:$0xff]  ;;  %209 = vmatpush.msra.mxu0 %v106_v21  ;;  %228 = vmatpush.msra.mxu1 %v174_v22  ;;  %v188_v12 = vld [vmem:[#allocation2 + $0x3d0] sm:$0xff] }
  0x1a   :  { %v167_v24 = vld [vmem:[#allocation2 + $0x328] sm:$0xff]  ;;  %269 = vmatpush.msra.mxu3 %v171_v20  ;;  %250 = vmatpush.msra.mxu2 %v103_v23  ;;  %v98_v29 = vld [vmem:[#allocation2 + $0x100] sm:$0xff]  ;;  %v113_v13 = vld [vmem:[#allocation2 + $0x178] sm:$0xff] }
  0x1b   :  { %v99_v27 = vld [vmem:[#allocation2 + $0x108] sm:$0xff]  ;;  %v166_v30 = vld [vmem:[#allocation2 + $0x320] sm:$0xff]  ;;  %210 = vmatpush.msra.mxu0 %v102_v25  ;;  %229 = vmatpush.msra.mxu1 %v170_v26  ;;  %v181_v14 = vld [vmem:[#allocation2 + $0x398] sm:$0xff] }
  0x1c   :  { %v163_v28 = vld [vmem:[#allocation2 + $0x308] sm:$0xff]  ;;  %270 = vmatpush.msra.mxu3 %v167_v24  ;;  %251 = vmatpush.msra.mxu2 %v99_v27  ;;  %v94_v33 = vld [vmem:[#allocation2 + $0xe0] sm:$0xff]  ;;  %v116_v16 = vld [vmem:[#allocation2 + $0x190] sm:$0xff] }
  0x1d   :  { %v95_v31 = vld [vmem:[#allocation2 + $0xe8] sm:$0xff]  ;;  %v162_v34 = vld [vmem:[#allocation2 + $0x300] sm:$0xff]  ;;  %211 = vmatpush.msra.mxu0 %v98_v29  ;;  %230 = vmatpush.msra.mxu1 %v166_v30  ;;  %v184_v17 = vld [vmem:[#allocation2 + $0x3b0] sm:$0xff] }
  0x1e   :  { %v159_v32 = vld [vmem:[#allocation2 + $0x2e8] sm:$0xff]  ;;  %271 = vmatpush.msra.mxu3 %v163_v28  ;;  %252 = vmatpush.msra.mxu2 %v95_v31  ;;  %v90_v37 = vld [vmem:[#allocation2 + $0xc0] sm:$0xff]  ;;  %v109_v18 = vld [vmem:[#allocation2 + $0x158] sm:$0xff] }
  0x1f   :  { %v91_v35 = vld [vmem:[#allocation2 + $0xc8] sm:$0xff]  ;;  %v158_v38 = vld [vmem:[#allocation2 + $0x2e0] sm:$0xff]  ;;  %212 = vmatpush.msra.mxu0 %v94_v33  ;;  %231 = vmatpush.msra.mxu1 %v162_v34  ;;  %v177_v19 = vld [vmem:[#allocation2 + $0x378] sm:$0xff] }
  0x20   :  { %v155_v36 = vld [vmem:[#allocation2 + $0x2c8] sm:$0xff]  ;;  %272 = vmatpush.msra.mxu3 %v159_v32  ;;  %253 = vmatpush.msra.mxu2 %v91_v35  ;;  %v86_v41 = vld [vmem:[#allocation2 + $0xa0] sm:$0xff]  ;;  %v112_v20 = vld [vmem:[#allocation2 + $0x170] sm:$0xff] }
  0x21   :  { %v87_v39 = vld [vmem:[#allocation2 + $0xa8] sm:$0xff]  ;;  %v154_v42 = vld [vmem:[#allocation2 + $0x2c0] sm:$0xff]  ;;  %213 = vmatpush.msra.mxu0 %v90_v37  ;;  %232 = vmatpush.msra.mxu1 %v158_v38  ;;  %v180_v21 = vld [vmem:[#allocation2 + $0x390] sm:$0xff] }
  0x22   :  { %v151_v40 = vld [vmem:[#allocation2 + $0x2a8] sm:$0xff]  ;;  %273 = vmatpush.msra.mxu3 %v155_v36  ;;  %254 = vmatpush.msra.mxu2 %v87_v39  ;;  %v82_v45 = vld [vmem:[#allocation2 + $0x80] sm:$0xff]  ;;  %v105_v22 = vld [vmem:[#allocation2 + $0x138] sm:$0xff] }
  0x23   :  { %v83_v43 = vld [vmem:[#allocation2 + $0x88] sm:$0xff]  ;;  %v150_v46 = vld [vmem:[#allocation2 + $0x2a0] sm:$0xff]  ;;  %214 = vmatpush.msra.mxu0 %v86_v41  ;;  %233 = vmatpush.msra.mxu1 %v154_v42  ;;  %v173_v23 = vld [vmem:[#allocation2 + $0x358] sm:$0xff] }
  0x24   :  { %v147_v44 = vld [vmem:[#allocation2 + $0x288] sm:$0xff]  ;;  %274 = vmatpush.msra.mxu3 %v151_v40  ;;  %255 = vmatpush.msra.mxu2 %v83_v43  ;;  %v78_v49 = vld [vmem:[#allocation2 + $0x60] sm:$0xff]  ;;  %v108_v24 = vld [vmem:[#allocation2 + $0x150] sm:$0xff] }
  0x25   :  { %v79_v47 = vld [vmem:[#allocation2 + $0x68] sm:$0xff]  ;;  %v146_v50 = vld [vmem:[#allocation2 + $0x280] sm:$0xff]  ;;  %215 = vmatpush.msra.mxu0 %v82_v45  ;;  %234 = vmatpush.msra.mxu1 %v150_v46  ;;  %v176_v25 = vld [vmem:[#allocation2 + $0x370] sm:$0xff] }
  0x26   :  { %v143_v48 = vld [vmem:[#allocation2 + $0x268] sm:$0xff]  ;;  %275 = vmatpush.msra.mxu3 %v147_v44  ;;  %256 = vmatpush.msra.mxu2 %v79_v47  ;;  %v74_v53 = vld [vmem:[#allocation2 + $0x40] sm:$0xff]  ;;  %v101_v26 = vld [vmem:[#allocation2 + $0x118] sm:$0xff] }
  0x27   :  { %v75_v51 = vld [vmem:[#allocation2 + $0x48] sm:$0xff]  ;;  %v142_v54 = vld [vmem:[#allocation2 + $0x260] sm:$0xff]  ;;  %216 = vmatpush.msra.mxu0 %v78_v49  ;;  %235 = vmatpush.msra.mxu1 %v146_v50  ;;  %v169_v27 = vld [vmem:[#allocation2 + $0x338] sm:$0xff] }
  0x28   :  { %v139_v52 = vld [vmem:[#allocation2 + $0x248] sm:$0xff]  ;;  %276 = vmatpush.msra.mxu3 %v143_v48  ;;  %257 = vmatpush.msra.mxu2 %v75_v51  ;;  %v70_v57 = vld [vmem:[#allocation2 + $0x20] sm:$0xff]  ;;  %v104_v28 = vld [vmem:[#allocation2 + $0x130] sm:$0xff] }
  0x29   :  { %v71_v55 = vld [vmem:[#allocation2 + $0x28] sm:$0xff]  ;;  %v138_v58 = vld [vmem:[#allocation2 + $0x240] sm:$0xff]  ;;  %217 = vmatpush.msra.mxu0 %v74_v53  ;;  %236 = vmatpush.msra.mxu1 %v142_v54  ;;  %v172_v29 = vld [vmem:[#allocation2 + $0x350] sm:$0xff] }
  0x2a   :  { %v135_v56 = vld [vmem:[#allocation2 + $0x228] sm:$0xff]  ;;  %277 = vmatpush.msra.mxu3 %v139_v52  ;;  %258 = vmatpush.msra.mxu2 %v71_v55  ;;  %v66_v62 = vld [vmem:[#allocation2] sm:$0xff]  ;;  %v97_v30 = vld [vmem:[#allocation2 + $0xf8] sm:$0xff] }
  0x2b   :  { %v67_v59 = vld [vmem:[#allocation2 + $0x8] sm:$0xff]  ;;  %218 = vmatpush.msra.mxu0 %v70_v57  ;;  %237 = vmatpush.msra.mxu1 %v138_v58  ;;  %v134_v63 = vld [vmem:[#allocation2 + $0x220] sm:$0xff]  ;;  %v165_v31 = vld [vmem:[#allocation2 + $0x318] sm:$0xff] }
  0x2c   :  { %v131_v60 = vld [vmem:[#allocation2 + $0x208] sm:$0xff]  ;;  %278 = vmatpush.msra.mxu3 %v135_v56  ;;  %259 = vmatpush.msra.mxu2 %v67_v59  ;;  %v130_v3 = vld [vmem:[#allocation2 + $0x200] sm:$0xff]  ;;  %v100_v32 = vld [vmem:[#allocation2 + $0x110] sm:$0xff] }
  0x2d   :  { %219 = vmatpush.msra.mxu0 %v66_v62  ;;  %238 = vmatpush.msra.mxu1 %v134_v63  ;;  %v1144_v11 = vld [vmem:[%s1256_s0] sm:$0x3]  ;;  %v168_v33 = vld [vmem:[#allocation2 + $0x330] sm:$0xff]  ;;  %v93_v34 = vld [vmem:[#allocation2 + $0xd8] sm:$0xff]  ;;  %s874_s0 = sshll.u32 %s1265_s9, 4  ;;  %s875_s0 = int_to_ptr.hbm [resolvable:$true] %s874_s0 }
  0x2e   :  { %279 = vmatpush.msra.mxu3 %v131_v60  ;;  %324 = vmatpush.msrb.mxu2 %v129_v61  ;;  %v1149_v15 = vld [vmem:[%s1257_s1] sm:$0x3]  ;;  %v161_v35 = vld [vmem:[#allocation2 + $0x2f8] sm:$0xff]  ;;  %v96_v36 = vld [vmem:[#allocation2 + $0xf0] sm:$0xff] }
  0x2f   :  { %284 = vmatpush.msrb.mxu0 %v128_v2  ;;  %239 = vmatpush.msra.mxu1 %v130_v3  ;;  %v164_v37 = vld [vmem:[#allocation2 + $0x310] sm:$0xff]  ;;  %v89_v38 = vld [vmem:[#allocation2 + $0xb8] sm:$0xff]  ;;  %v494_v2 = vld [vmem:[#allocation2 + $0x5e0] sm:$0xff] }
  0x30   :  { %344 = vmatpush.msrb.mxu3 %v193_v0  ;;  %325 = vmatpush.msrb.mxu2 %v125_v1  ;;  %v157_v39 = vld [vmem:[#allocation2 + $0x2d8] sm:$0xff]  ;;  %v92_v40 = vld [vmem:[#allocation2 + $0xd0] sm:$0xff]  ;;  %v495_v3 = vld [vmem:[#allocation2 + $0x5e8] sm:$0xff] }
  0x31   :  { %285 = vmatpush.msrb.mxu0 %v124_v6  ;;  %304 = vmatpush.msrb.mxu1 %v192_v7  ;;  %v160_v41 = vld [vmem:[#allocation2 + $0x2f0] sm:$0xff]  ;;  %v85_v42 = vld [vmem:[#allocation2 + $0x98] sm:$0xff]  ;;  %v491_v6 = vld [vmem:[#allocation2 + $0x5c8] sm:$0xff] }
  0x32   :  { %345 = vmatpush.msrb.mxu3 %v189_v4  ;;  %326 = vmatpush.msrb.mxu2 %v121_v5  ;;  %v153_v43 = vld [vmem:[#allocation2 + $0x2b8] sm:$0xff]  ;;  %v88_v44 = vld [vmem:[#allocation2 + $0xb0] sm:$0xff]  ;;  %v490_v4 = vld [vmem:[#allocation2 + $0x5c0] sm:$0xff] }
  0x33   :  { %286 = vmatpush.msrb.mxu0 %v120_v10  ;;  %260 = vmatmul.f32.vlgmr.msra.gmra.mxu2 %v1144_v11  ;;  %v156_v45 = vld [vmem:[#allocation2 + $0x2d0] sm:$0xff]  ;;  %v81_v46 = vld [vmem:[#allocation2 + $0x78] sm:$0xff]  ;;  %v558_v5 = vld [vmem:[#allocation2 + $0x7e0] sm:$0xff] }
  0x34   :  { %346 = vmatpush.msrb.mxu3 %v185_v8  ;;  %327 = vmatpush.msrb.mxu2 %v117_v9  ;;  %v149_v47 = vld [vmem:[#allocation2 + $0x298] sm:$0xff]  ;;  %v84_v48 = vld [vmem:[#allocation2 + $0x90] sm:$0xff]  ;;  %v559_v7 = vld [vmem:[#allocation2 + $0x7e8] sm:$0xff] }
  0x35   :  { %305 = vmatpush.msrb.mxu1 %v188_v12  ;;  %280 = vmatmul.f32.vlgmr.msra.gmra.mxu3 %v1149_v15  ;;  %v152_v49 = vld [vmem:[#allocation2 + $0x2b0] sm:$0xff]  ;;  %v77_v50 = vld [vmem:[#allocation2 + $0x58] sm:$0xff]  ;;  %v486_v8 = vld [vmem:[#allocation2 + $0x5a0] sm:$0xff] }
  0x36   :  { %328 = vmatpush.msrb.mxu2 %v113_v13  ;;  %347 = vmatpush.msrb.mxu3 %v181_v14  ;;  %v145_v51 = vld [vmem:[#allocation2 + $0x278] sm:$0xff]  ;;  %v80_v52 = vld [vmem:[#allocation2 + $0x70] sm:$0xff]  ;;  %v554_v9 = vld [vmem:[#allocation2 + $0x7c0] sm:$0xff] }
  0x37   :  { %287 = vmatpush.msrb.mxu0 %v116_v16  ;;  %306 = vmatpush.msrb.mxu1 %v184_v17  ;;  %v148_v53 = vld [vmem:[#allocation2 + $0x290] sm:$0xff]  ;;  %v73_v54 = vld [vmem:[#allocation2 + $0x38] sm:$0xff]  ;;  %v487_v10 = vld [vmem:[#allocation2 + $0x5a8] sm:$0xff] }
  0x38   :  { %329 = vmatpush.msrb.mxu2 %v109_v18  ;;  %348 = vmatpush.msrb.mxu3 %v177_v19  ;;  %v141_v55 = vld [vmem:[#allocation2 + $0x258] sm:$0xff]  ;;  %v76_v56 = vld [vmem:[#allocation2 + $0x50] sm:$0xff]  ;;  %v482_v12 = vld [vmem:[#allocation2 + $0x580] sm:$0xff] }
  0x39   :  { %288 = vmatpush.msrb.mxu0 %v112_v20  ;;  %307 = vmatpush.msrb.mxu1 %v180_v21  ;;  %v144_v57 = vld [vmem:[#allocation2 + $0x270] sm:$0xff]  ;;  %v69_v58 = vld [vmem:[#allocation2 + $0x18] sm:$0xff]  ;;  %v550_v13 = vld [vmem:[#allocation2 + $0x7a0] sm:$0xff] }
  0x3a   :  { %330 = vmatpush.msrb.mxu2 %v105_v22  ;;  %349 = vmatpush.msrb.mxu3 %v173_v23  ;;  %v137_v59 = vld [vmem:[#allocation2 + $0x238] sm:$0xff]  ;;  %v72_v60 = vld [vmem:[#allocation2 + $0x30] sm:$0xff]  ;;  %v483_v14 = vld [vmem:[#allocation2 + $0x588] sm:$0xff] }
  0x3b   :  { %220 = vmatmul.f32.vlgmr.msra.gmra.mxu0 %v1144_v11  ;;  %308 = vmatpush.msrb.mxu1 %v176_v25  ;;  %v140_v61 = vld [vmem:[#allocation2 + $0x250] sm:$0xff]  ;;  %v133_v62 = vld [vmem:[#allocation2 + $0x218] sm:$0xff]  ;;  %v478_v16 = vld [vmem:[#allocation2 + $0x560] sm:$0xff] }
  0x3c   :  { %289 = vmatpush.msrb.mxu0 %v108_v24  ;;  %331 = vmatpush.msrb.mxu2 %v101_v26  ;;  %v68_v63 = vld [vmem:[#allocation2 + $0x10] sm:$0xff]  ;;  %v546_v17 = vld [vmem:[#allocation2 + $0x780] sm:$0xff]  ;;  %v479_v18 = vld [vmem:[#allocation2 + $0x568] sm:$0xff] }
  0x3d   :  { %350 = vmatpush.msrb.mxu3 %v169_v27  ;;  %240 = vmatmul.f32.vlgmr.msra.gmra.mxu1 %v1149_v15  ;;  %v136_v0 = vld [vmem:[#allocation2 + $0x230] sm:$0xff]  ;;  %v547_v19 = vld [vmem:[#allocation2 + $0x788] sm:$0xff]  ;;  %v474_v20 = vld [vmem:[#allocation2 + $0x540] sm:$0xff] }
  0x3e   :  { %290 = vmatpush.msrb.mxu0 %v104_v28  ;;  %309 = vmatpush.msrb.mxu1 %v172_v29  ;;  %v132_v1 = vld [vmem:[#allocation2 + $0x210] sm:$0xff]  ;;  %v542_v21 = vld [vmem:[#allocation2 + $0x760] sm:$0xff]  ;;  %v475_v22 = vld [vmem:[#allocation2 + $0x548] sm:$0xff] }
  0x3f   :  { %332 = vmatpush.msrb.mxu2 %v97_v30  ;;  %351 = vmatpush.msrb.mxu3 %v165_v31  ;;  %v543_v23 = vld [vmem:[#allocation2 + $0x768] sm:$0xff]  ;;  %v470_v24 = vld [vmem:[#allocation2 + $0x520] sm:$0xff] }
  0x40   :  { %291 = vmatpush.msrb.mxu0 %v100_v32  ;;  %310 = vmatpush.msrb.mxu1 %v168_v33  ;;  %v538_v25 = vld [vmem:[#allocation2 + $0x740] sm:$0xff]  ;;  %v471_v26 = vld [vmem:[#allocation2 + $0x528] sm:$0xff] }
  0x41   :  { %333 = vmatpush.msrb.mxu2 %v93_v34  ;;  %352 = vmatpush.msrb.mxu3 %v161_v35  ;;  %v539_v27 = vld [vmem:[#allocation2 + $0x748] sm:$0xff]  ;;  %v466_v28 = vld [vmem:[#allocation2 + $0x500] sm:$0xff] }
  0x42   :  { %292 = vmatpush.msrb.mxu0 %v96_v36  ;;  %311 = vmatpush.msrb.mxu1 %v164_v37  ;;  %v534_v29 = vld [vmem:[#allocation2 + $0x720] sm:$0xff]  ;;  %v467_v30 = vld [vmem:[#allocation2 + $0x508] sm:$0xff] }
  0x43   :  { %334 = vmatpush.msrb.mxu2 %v89_v38  ;;  %353 = vmatpush.msrb.mxu3 %v157_v39  ;;  %v535_v31 = vld [vmem:[#allocation2 + $0x728] sm:$0xff]  ;;  %v462_v32 = vld [vmem:[#allocation2 + $0x4e0] sm:$0xff] }
  0x44   :  { %293 = vmatpush.msrb.mxu0 %v92_v40  ;;  %312 = vmatpush.msrb.mxu1 %v160_v41  ;;  %v530_v33 = vld [vmem:[#allocation2 + $0x700] sm:$0xff]  ;;  %v463_v34 = vld [vmem:[#allocation2 + $0x4e8] sm:$0xff] }
  0x45   :  { %335 = vmatpush.msrb.mxu2 %v85_v42  ;;  %354 = vmatpush.msrb.mxu3 %v153_v43  ;;  %v531_v35 = vld [vmem:[#allocation2 + $0x708] sm:$0xff]  ;;  %v458_v36 = vld [vmem:[#allocation2 + $0x4c0] sm:$0xff] }
  0x46   :  { %294 = vmatpush.msrb.mxu0 %v88_v44  ;;  %313 = vmatpush.msrb.mxu1 %v156_v45  ;;  %v526_v37 = vld [vmem:[#allocation2 + $0x6e0] sm:$0xff]  ;;  %v459_v38 = vld [vmem:[#allocation2 + $0x4c8] sm:$0xff] }
  0x47   :  { %336 = vmatpush.msrb.mxu2 %v81_v46  ;;  %355 = vmatpush.msrb.mxu3 %v149_v47  ;;  %v1162_v39 = vld [vmem:[%s1260_s4] sm:$0xf]  ;;  %v527_v40 = vld [vmem:[#allocation2 + $0x6e8] sm:$0xff] }
  0x48   :  { %295 = vmatpush.msrb.mxu0 %v84_v48  ;;  %314 = vmatpush.msrb.mxu1 %v152_v49  ;;  %v454_v41 = vld [vmem:[#allocation2 + $0x4a0] sm:$0xff]  ;;  %v455_v43 = vld [vmem:[#allocation2 + $0x4a8] sm:$0xff]  ;;  %v196_v48 = vperm.slane %v1162_v39, 0  ;;  %v197_v49 = vperm.slane %v1162_v39, 1 }
  0x49   :  { %337 = vmatpush.msrb.mxu2 %v77_v50  ;;  %356 = vmatpush.msrb.mxu3 %v145_v51  ;;  %v522_v42 = vld [vmem:[#allocation2 + $0x6c0] sm:$0xff]  ;;  %v523_v44 = vld [vmem:[#allocation2 + $0x6c8] sm:$0xff] }
  0x4a   :  { %296 = vmatpush.msrb.mxu0 %v80_v52  ;;  %315 = vmatpush.msrb.mxu1 %v148_v53  ;;  %v450_v45 = vld [vmem:[#allocation2 + $0x480] sm:$0xff]  ;;  %v451_v47 = vld [vmem:[#allocation2 + $0x488] sm:$0xff] }
  0x4b   :  { %338 = vmatpush.msrb.mxu2 %v73_v54  ;;  %357 = vmatpush.msrb.mxu3 %v141_v55  ;;  %v518_v46 = vld [vmem:[#allocation2 + $0x6a0] sm:$0xff]  ;;  %v519_v50 = vld [vmem:[#allocation2 + $0x6a8] sm:$0xff] }
  0x4c   :  { %297 = vmatpush.msrb.mxu0 %v76_v56  ;;  %316 = vmatpush.msrb.mxu1 %v144_v57  ;;  %v446_v51 = vld [vmem:[#allocation2 + $0x460] sm:$0xff]  ;;  %v447_v53 = vld [vmem:[#allocation2 + $0x468] sm:$0xff] }
  0x4d   :  { %339 = vmatpush.msrb.mxu2 %v69_v58  ;;  %358 = vmatpush.msrb.mxu3 %v137_v59  ;;  %v514_v52 = vld [vmem:[#allocation2 + $0x680] sm:$0xff]  ;;  %v515_v54 = vld [vmem:[#allocation2 + $0x688] sm:$0xff] }
  0x4e   :  { %298 = vmatpush.msrb.mxu0 %v72_v60  ;;  %317 = vmatpush.msrb.mxu1 %v140_v61  ;;  %v442_v57 = vld [vmem:[#allocation2 + $0x440] sm:$0xff]  ;;  %v443_v59 = vld [vmem:[#allocation2 + $0x448] sm:$0xff] }
  0x4f   :  { %340 = vmatmul.f32.vlgmr.msrb.gmra.mxu2 %v1144_v11  ;;  %359 = vmatpush.msrb.mxu3 %v133_v62  ;;  %v510_v58 = vld [vmem:[#allocation2 + $0x660] sm:$0xff]  ;;  %v511_v62 = vld [vmem:[#allocation2 + $0x668] sm:$0xff] }
  0x50   :  { %299 = vmatpush.msrb.mxu0 %v68_v63  ;;  %318 = vmatpush.msrb.mxu1 %v136_v0  ;;  %v438_v0 = vld [vmem:[#allocation2 + $0x420] sm:$0xff] }
  0x51   :  { %360 = vmatmul.f32.vlgmr.msrb.gmra.mxu3 %v1149_v15  ;;  %300 = vmatmul.f32.vlgmr.msrb.gmra.mxu0 %v1144_v11  ;;  %v555_v11 = vld [vmem:[#allocation2 + $0x7c8] sm:$0xff] }
  0x52   :  { %319 = vmatpush.msrb.mxu1 %v132_v1  ;;  %573 = vmatpush.msra.mxu0 %v494_v2  ;;  %v506_v1 = vld [vmem:[#allocation2 + $0x640] sm:$0xff]  ;;  %v439_v2 = vld [vmem:[#allocation2 + $0x428] sm:$0xff] }
  0x53   :  { %320 = vmatmul.f32.vlgmr.msrb.gmra.mxu1 %v1149_v15  ;;  %613 = vmatpush.msra.mxu2 %v495_v3  ;;  %v551_v15 = vld [vmem:[#allocation2 + $0x7a8] sm:$0xff] }
  0x54   :  { %574 = vmatpush.msra.mxu0 %v490_v4  ;;  %593 = vmatpush.msra.mxu1 %v558_v5  ;;  %v507_v5 = vld [vmem:[#allocation2 + $0x648] sm:$0xff] }
  0x55   :  { %614 = vmatpush.msra.mxu2 %v491_v6  ;;  %633 = vmatpush.msra.mxu3 %v559_v7  ;;  %v434_v7 = vld [vmem:[#allocation2 + $0x400] sm:$0xff] }
  0x56   :  { %575 = vmatpush.msra.mxu0 %v486_v8  ;;  %594 = vmatpush.msra.mxu1 %v554_v9  ;;  %v502_v8 = vld [vmem:[#allocation2 + $0x620] sm:$0xff]  ;;  %v435_v9 = vld [vmem:[#allocation2 + $0x408] sm:$0xff] }
  0x57   :  { %615 = vmatpush.msra.mxu2 %v487_v10  ;;  %634 = vmatpush.msra.mxu3 %v555_v11  ;;  %v503_v11 = vld [vmem:[#allocation2 + $0x628] sm:$0xff] }
  0x58   :  { %576 = vmatpush.msra.mxu0 %v482_v12  ;;  %595 = vmatpush.msra.mxu1 %v550_v13  ;;  %v496_v12 = vld [vmem:[#allocation2 + $0x5f0] sm:$0xff]  ;;  %v497_v13 = vld [vmem:[#allocation2 + $0x5f8] sm:$0xff] }
  0x59   :  { %616 = vmatpush.msra.mxu2 %v483_v14  ;;  %635 = vmatpush.msra.mxu3 %v551_v15  ;;  %v498_v15 = vld [vmem:[#allocation2 + $0x600] sm:$0xff] }
  0x5a   :  { %577 = vmatpush.msra.mxu0 %v478_v16  ;;  %596 = vmatpush.msra.mxu1 %v546_v17  ;;  %v499_v16 = vld [vmem:[#allocation2 + $0x608] sm:$0xff]  ;;  %v492_v17 = vld [vmem:[#allocation2 + $0x5d0] sm:$0xff] }
  0x5b   :  { %617 = vmatpush.msra.mxu2 %v479_v18  ;;  %636 = vmatpush.msra.mxu3 %v547_v19  ;;  %v560_v18 = vld [vmem:[#allocation2 + $0x7f0] sm:$0xff]  ;;  %v493_v19 = vld [vmem:[#allocation2 + $0x5d8] sm:$0xff] }
  0x5c   :  { %578 = vmatpush.msra.mxu0 %v474_v20  ;;  %597 = vmatpush.msra.mxu1 %v542_v21  ;;  %v561_v20 = vld [vmem:[#allocation2 + $0x7f8] sm:$0xff]  ;;  %v488_v21 = vld [vmem:[#allocation2 + $0x5b0] sm:$0xff] }
  0x5d   :  { %618 = vmatpush.msra.mxu2 %v475_v22  ;;  %637 = vmatpush.msra.mxu3 %v543_v23  ;;  %v556_v22 = vld [vmem:[#allocation2 + $0x7d0] sm:$0xff]  ;;  %v489_v23 = vld [vmem:[#allocation2 + $0x5b8] sm:$0xff] }
  0x5e   :  { %579 = vmatpush.msra.mxu0 %v470_v24  ;;  %598 = vmatpush.msra.mxu1 %v538_v25  ;;  %v557_v24 = vld [vmem:[#allocation2 + $0x7d8] sm:$0xff]  ;;  %v484_v25 = vld [vmem:[#allocation2 + $0x590] sm:$0xff] }
  0x5f   :  { %619 = vmatpush.msra.mxu2 %v471_v26  ;;  %638 = vmatpush.msra.mxu3 %v539_v27  ;;  %v552_v26 = vld [vmem:[#allocation2 + $0x7b0] sm:$0xff]  ;;  %v485_v27 = vld [vmem:[#allocation2 + $0x598] sm:$0xff] }
  0x60   :  { %580 = vmatpush.msra.mxu0 %v466_v28  ;;  %599 = vmatpush.msra.mxu1 %v534_v29  ;;  %v553_v28 = vld [vmem:[#allocation2 + $0x7b8] sm:$0xff] }
  0x61   :  { %620 = vmatpush.msra.mxu2 %v467_v30  ;;  %639 = vmatpush.msra.mxu3 %v535_v31  ;;  %v480_v30 = vld [vmem:[#allocation2 + $0x570] sm:$0xff] }
  0x62   :  { %581 = vmatpush.msra.mxu0 %v462_v32  ;;  %600 = vmatpush.msra.mxu1 %v530_v33  ;;  %v548_v31 = vld [vmem:[#allocation2 + $0x790] sm:$0xff]  ;;  %v481_v32 = vld [vmem:[#allocation2 + $0x578] sm:$0xff] }
  0x63   :  { %621 = vmatpush.msra.mxu2 %v463_v34  ;;  %640 = vmatpush.msra.mxu3 %v531_v35  ;;  %v549_v35 = vld [vmem:[#allocation2 + $0x798] sm:$0xff] }
  0x64   :  { %582 = vmatpush.msra.mxu0 %v458_v36  ;;  %601 = vmatpush.msra.mxu1 %v526_v37  ;;  %v476_v37 = vld [vmem:[#allocation2 + $0x550] sm:$0xff] }
  0x65   :  { %622 = vmatpush.msra.mxu2 %v459_v38  ;;  %641 = vmatpush.msra.mxu3 %v527_v40  ;;  %v544_v38 = vld [vmem:[#allocation2 + $0x770] sm:$0xff]  ;;  %v477_v40 = vld [vmem:[#allocation2 + $0x558] sm:$0xff] }
  0x66   :  { %583 = vmatpush.msra.mxu0 %v454_v41  ;;  %602 = vmatpush.msra.mxu1 %v522_v42  ;;  %v545_v41 = vld [vmem:[#allocation2 + $0x778] sm:$0xff]  ;;  %v472_v42 = vld [vmem:[#allocation2 + $0x530] sm:$0xff] }
  0x67   :  { %623 = vmatpush.msra.mxu2 %v455_v43  ;;  %642 = vmatpush.msra.mxu3 %v523_v44  ;;  %v540_v43 = vld [vmem:[#allocation2 + $0x750] sm:$0xff]  ;;  %v473_v44 = vld [vmem:[#allocation2 + $0x538] sm:$0xff] }
  0x68   :  { %584 = vmatpush.msra.mxu0 %v450_v45  ;;  %603 = vmatpush.msra.mxu1 %v518_v46  ;;  %v541_v45 = vld [vmem:[#allocation2 + $0x758] sm:$0xff]  ;;  %v468_v46 = vld [vmem:[#allocation2 + $0x510] sm:$0xff] }
  0x69   :  { %624 = vmatpush.msra.mxu2 %v451_v47  ;;  %643 = vmatpush.msra.mxu3 %v519_v50  ;;  %v536_v47 = vld [vmem:[#allocation2 + $0x730] sm:$0xff]  ;;  %v537_v50 = vld [vmem:[#allocation2 + $0x738] sm:$0xff] }
  0x6a   :  { %585 = vmatpush.msra.mxu0 %v446_v51  ;;  %604 = vmatpush.msra.mxu1 %v514_v52  ;;  %v464_v51 = vld [vmem:[#allocation2 + $0x4f0] sm:$0xff] }
  0x6b   :  { %625 = vmatpush.msra.mxu2 %v447_v53  ;;  %644 = vmatpush.msra.mxu3 %v515_v54  ;;  %v532_v52 = vld [vmem:[#allocation2 + $0x710] sm:$0xff]  ;;  %v465_v53 = vld [vmem:[#allocation2 + $0x4f8] sm:$0xff] }
  0x6c   :  { %586 = vmatpush.msra.mxu0 %v442_v57  ;;  %605 = vmatpush.msra.mxu1 %v510_v58  ;;  %v528_v57 = vld [vmem:[#allocation2 + $0x6f0] sm:$0xff] }
  0x6d   :  { %626 = vmatpush.msra.mxu2 %v443_v59  ;;  %645 = vmatpush.msra.mxu3 %v511_v62  ;;  %v199_v62 = vperm.slane %v1162_v39, 3 }
  0x6e   :  { %587 = vmatpush.msra.mxu0 %v438_v0  ;;  %606 = vmatpush.msra.mxu1 %v506_v1  ;;  %v529_v0 = vld [vmem:[#allocation2 + $0x6f8] sm:$0xff] }
  0x6f   :  { %627 = vmatpush.msra.mxu2 %v439_v2  ;;  %646 = vmatpush.msra.mxu3 %v507_v5  ;;  %v524_v5 = vld [vmem:[#allocation2 + $0x6d0] sm:$0xff] }
  0x70   :  { %588 = vmatpush.msra.mxu0 %v434_v7  ;;  %607 = vmatpush.msra.mxu1 %v502_v8  ;;  %v457_v8 = vld [vmem:[#allocation2 + $0x4b8] sm:$0xff] }
  0x71   :  { %628 = vmatpush.msra.mxu2 %v435_v9  ;;  %647 = vmatpush.msra.mxu3 %v503_v11  ;;  %v525_v9 = vld [vmem:[#allocation2 + $0x6d8] sm:$0xff] }
  0x72   :  { %653 = vmatpush.msrb.mxu0 %v496_v12  ;;  %608 = vmatpush.msra.mxu1 %v498_v15  ;;  %v520_v15 = vld [vmem:[#allocation2 + $0x6b0] sm:$0xff] }
  0x73   :  { %693 = vmatpush.msrb.mxu2 %v497_v13  ;;  %648 = vmatpush.msra.mxu3 %v499_v16 }
  0x74   :  { %654 = vmatpush.msrb.mxu0 %v492_v17  ;;  %673 = vmatpush.msrb.mxu1 %v560_v18  ;;  %v810_v17 = vld [vmem:[#allocation5 + $0x50] sm:$0xff] }
  0x75   :  { %694 = vmatpush.msrb.mxu2 %v493_v19  ;;  %713 = vmatpush.msrb.mxu3 %v561_v20  ;;  %v453_v19 = vld [vmem:[#allocation2 + $0x498] sm:$0xff] }
  0x76   :  { %655 = vmatpush.msrb.mxu0 %v488_v21  ;;  %674 = vmatpush.msrb.mxu1 %v556_v22  ;;  %v521_v20 = vld [vmem:[#allocation2 + $0x6b8] sm:$0xff] }
  0x77   :  { %695 = vmatpush.msrb.mxu2 %v489_v23  ;;  %714 = vmatpush.msrb.mxu3 %v557_v24 }
  0x78   :  { %656 = vmatpush.msrb.mxu0 %v484_v25  ;;  %675 = vmatpush.msrb.mxu1 %v552_v26 }
  0x79   :  { %696 = vmatpush.msrb.mxu2 %v485_v27  ;;  %715 = vmatpush.msrb.mxu3 %v553_v28  ;;  %v807_v27 = vld [vmem:[#allocation5 + $0x38] sm:$0xff] }
  0x7a   :  { %657 = vmatpush.msrb.mxu0 %v480_v30  ;;  %676 = vmatpush.msrb.mxu1 %v548_v31  ;;  %v516_v30 = vld [vmem:[#allocation2 + $0x690] sm:$0xff]  ;;  %v449_v31 = vld [vmem:[#allocation2 + $0x478] sm:$0xff] }
  0x7b   :  { %697 = vmatpush.msrb.mxu2 %v481_v32  ;;  %716 = vmatpush.msrb.mxu3 %v549_v35  ;;  %v65_v32 = vld [vmem:[%s1258_s2] sm:$0x3]  ;;  %v517_v35 = vld [vmem:[#allocation2 + $0x698] sm:$0xff] }
  0x7c   :  { %658 = vmatpush.msrb.mxu0 %v476_v37  ;;  %677 = vmatpush.msrb.mxu1 %v544_v38 }
  0x7d   :  { %698 = vmatpush.msrb.mxu2 %v477_v40  ;;  %717 = vmatpush.msrb.mxu3 %v545_v41  ;;  %v444_v40 = vld [vmem:[#allocation2 + $0x450] sm:$0xff] }
  0x7e   :  { %659 = vmatpush.msrb.mxu0 %v472_v42  ;;  %678 = vmatpush.msrb.mxu1 %v540_v43  ;;  %v512_v41 = vld [vmem:[#allocation2 + $0x670] sm:$0xff] }
  0x7f   :  { %699 = vmatpush.msrb.mxu2 %v473_v44  ;;  %718 = vmatpush.msrb.mxu3 %v541_v45  ;;  %v445_v44 = vld [vmem:[#allocation2 + $0x458] sm:$0xff] }
  0x80   :  { %660 = vmatpush.msrb.mxu0 %v468_v46  ;;  %679 = vmatpush.msrb.mxu1 %v536_v47  ;;  %v513_v45 = vld [vmem:[#allocation2 + $0x678] sm:$0xff] }
  0x81   :  { %719 = vmatpush.msrb.mxu3 %v537_v50 }
  0x82   :  { %661 = vmatpush.msrb.mxu0 %v464_v51  ;;  %680 = vmatpush.msrb.mxu1 %v532_v52  ;;  %v441_v51 = vld [vmem:[#allocation2 + $0x438] sm:$0xff] }
  0x83   :  { %v509_v52 = vld [vmem:[#allocation2 + $0x658] sm:$0xff] }
  0x84   :  { %681 = vmatpush.msrb.mxu1 %v528_v57  ;;  %v505_v57 = vld [vmem:[#allocation2 + $0x638] sm:$0xff] }
  0x86   :  { %682 = vmatpush.msrb.mxu1 %v524_v5 }
  0x88   :  { %683 = vmatpush.msrb.mxu1 %v520_v15 }
  0x8a   :  { %684 = vmatpush.msrb.mxu1 %v516_v30  ;;  %v806_v30 = vld [vmem:[#allocation5 + $0x30] sm:$0xff] }
  0x8c   :  { %685 = vmatpush.msrb.mxu1 %v512_v41 }
  0xb6   :  { %v261_v56 = vpop.f32.mrf.mxu2 }
  0xb7   :  { %v262_v61 = vadd.f32 %v261_v56, %v197_v49  ;;  %v198_v49 = vperm.slane %v1162_v39, 2  ;;  %v460_v56 = vld [vmem:[#allocation2 + $0x4d0] sm:$0xff] }
  0xb8   :  { %v221_v55 = vpop.f32.mrf.mxu0  ;;  %v281_v63 = vpop.f32.mrf.mxu3  ;;  %662 = vmatpush.msrb.mxu0 %v460_v56  ;;  %v437_v56 = vld [vmem:[#allocation2 + $0x418] sm:$0xff] }
  0xb9   :  { %v222_v60 = vadd.f32 %v221_v55, %v196_v48  ;;  %v282_v4 = vadd.f32 %v281_v63, %v262_v61  ;;  %v469_v48 = vld [vmem:[#allocation2 + $0x518] sm:$0xff] }
  0xba   :  { %v241_v3 = vpop.f32.mrf.mxu1  ;;  %700 = vmatpush.msrb.mxu2 %v469_v48  ;;  %v533_v55 = vld [vmem:[#allocation2 + $0x718] sm:$0xff]  ;;  %v440_v48 = vld [vmem:[#allocation2 + $0x430] sm:$0xff] }
  0xbb   :  { %v242_v6 = vadd.f32 %v241_v3, %v222_v60  ;;  %v895_v10 = vmul.f32 -1.442695, %v282_v4  ;;  %v461_v63 = vld [vmem:[#allocation2 + $0x4d8] sm:$0xff]  ;;  %720 = vmatpush.msrb.mxu3 %v533_v55  ;;  %v456_v4 = vld [vmem:[#allocation2 + $0x4b0] sm:$0xff] }
  0xbc   :  { %701 = vmatpush.msrb.mxu2 %v465_v53  ;;  %663 = vmatpush.msrb.mxu0 %v456_v4  ;;  %v504_v55 = vld [vmem:[#allocation2 + $0x630] sm:$0xff] }
  0xbd   :  { %v894_v14 = vmul.f32 -1.442695, %v242_v6  ;;  %914 = vpow2.f32 %v895_v10  ;;  %721 = vmatpush.msrb.mxu3 %v529_v0 }
  0xbe   :  { %702 = vmatpush.msrb.mxu2 %v461_v63 }
  0xbf   :  { %916 = vpow2.f32 %v894_v14  ;;  %v452_v14 = vld [vmem:[#allocation2 + $0x490] sm:$0xff]  ;;  %722 = vmatpush.msrb.mxu3 %v525_v9 }
  0xc0   :  { %703 = vmatpush.msrb.mxu2 %v457_v8  ;;  %664 = vmatpush.msrb.mxu0 %v452_v14  ;;  %v812_v14 = vld [vmem:[#allocation5 + $0x60] sm:$0xff] }
  0xc1   :  { %723 = vmatpush.msrb.mxu3 %v521_v20 }
  0xc2   :  { %704 = vmatpush.msrb.mxu2 %v453_v19 }
  0xc3   :  { %v915_v29 = vpop.eup %914  ;;  %724 = vmatpush.msrb.mxu3 %v517_v35  ;;  %v804_v35 = vld [vmem:[#allocation5 + $0x20] sm:$0xff] }
  0xc4   :  { %v1166_v34 = vadd.f32 1.0, %v915_v29  ;;  %v448_v29 = vld [vmem:[#allocation2 + $0x470] sm:$0xff]  ;;  %705 = vmatpush.msrb.mxu2 %v449_v31 }
  0xc5   :  { %v917_v33 = vpop.eup %916  ;;  %665 = vmatpush.msrb.mxu0 %v448_v29  ;;  %725 = vmatpush.msrb.mxu3 %v513_v45 }
  0xc6   :  { %v1168_v36 = vadd.f32 1.0, %v917_v33  ;;  %918 = vrcp.f32 %v1166_v34  ;;  %vm392_vm0 = vweird.f32 %v1166_v34  ;;  %v398_v60 = vand.u32 2147483648, %v1166_v34  ;;  %706 = vmatpush.msrb.mxu2 %v445_v44  ;;  %v801_v44 = vld [vmem:[#allocation5 + $0x8] sm:$0xff] }
  0xc7   :  { %v396_v3 = vand.u32 2147483647, %v1166_v34  ;;  %666 = vmatpush.msrb.mxu0 %v444_v40  ;;  %726 = vmatpush.msrb.mxu3 %v509_v52 }
  0xc8   :  { %920 = vrcp.f32 %v1168_v36  ;;  %vm373_vm2 = vweird.f32 %v1168_v36  ;;  %v379_v39 = vand.u32 2147483648, %v1168_v36  ;;  %v377_v12 = vand.u32 2147483647, %v1168_v36  ;;  %707 = vmatpush.msrb.mxu2 %v441_v51 }
  0xc9   :  { %v399_v21 = vor.u32 1.1754944e-38, %v398_v60  ;;  %vm1209_vm6 = vcmp.eq.f32.partialorder %v396_v3, 8.507059e+37  ;;  %667 = vmatpush.msrb.mxu0 %v440_v48  ;;  %v501_v60 = vld [vmem:[#allocation2 + $0x618] sm:$0xff]  ;;  %727 = vmatpush.msrb.mxu3 %v505_v57 }
  0xca   :  { %v380_v25 = vor.u32 1.1754944e-38, %v379_v39  ;;  %vm1217_vm7 = vcmp.eq.f32.partialorder %v377_v12, 8.507059e+37  ;;  %708 = vmatpush.msrb.mxu2 %v437_v56  ;;  %v813_v12 = vld [vmem:[#allocation5 + $0x68] sm:$0xff] }
  0xcb   :  { %728 = vmatpush.msrb.mxu3 %v501_v60 }
  0xcc   :  { %v1173_v54 = vpop.eup %918 }
  0xcd   :  { %v388_v59 = vmul.f32 %v1173_v54, %v1166_v34  ;;  %vm393_vm1 = vweird.f32 %v1173_v54 }
  0xce   :  { %v1175_v58 = vpop.eup %920  ;;  %v301_v61 = vpop.f32.mrf.mxu0  ;;  %vm1195_vm4 = vmor %vm392_vm0, %vm393_vm1 }
  0xcf   :  { %v369_v1 = vmul.f32 %v1175_v58, %v1168_v36  ;;  %v302_v2 = vadd.f32 %v301_v61, %v198_v49  ;;  %v389_v6 = vsub.f32 1.0, %v388_v59  ;;  %vm374_vm3 = vweird.f32 %v1175_v58  ;;  %v897_v36 = vld [vmem:[%s1257_s1 + $0x2] sm:$0x3]  ;;  %v508_v49 = vld [vmem:[#allocation2 + $0x650] sm:$0xff] }
  0xd0   :  { %v321_v7 = vpop.f32.mrf.mxu1  ;;  %vm1204_vm5 = vmor %vm373_vm2, %vm374_vm3  ;;  %609 = vmatmul.f32.vlgmr.msra.gmra.mxu1 %v897_v36  ;;  %649 = vmatmul.f32.vlgmr.msra.gmra.mxu3 %v897_v36  ;;  %v500_v59 = vld [vmem:[#allocation2 + $0x610] sm:$0xff] }
  0xd1   :  { %v370_v10 = vsub.f32 1.0, %v369_v1  ;;  %v322_v11 = vadd.f32 %v321_v7, %v302_v2  ;;  %v390_v16 = vmul.f32 %v1173_v54, %v389_v6  ;;  %686 = vmatpush.msrb.mxu1 %v508_v49 }
  0xd2   :  { %v341_v13 = vpop.f32.mrf.mxu2 }
  0xd3   :  { %v342_v18 = vadd.f32 %v341_v13, %v199_v62  ;;  %v371_v22 = vmul.f32 %v1175_v58, %v370_v10  ;;  %922 = vtanh.f32 %v322_v11  ;;  %v391_v26 = vadd.f32 %v1173_v54, %v390_v16  ;;  %687 = vmatpush.msrb.mxu1 %v504_v55  ;;  %v815_v10 = vld [vmem:[#allocation5 + $0x78] sm:$0xff]  ;;  %v814_v11 = vld [vmem:[#allocation5 + $0x70] sm:$0xff]  ;;  %v899_v13 = vld [vmem:[%s1260_s4 + $0x4] sm:$0xf] }
  0xd4   :  { %v361_v24 = vpop.f32.mrf.mxu3  ;;  %v565_v15 = vperm.slane %v899_v13, 0  ;;  %v811_v16 = vld [vmem:[#allocation5 + $0x58] sm:$0xff]  ;;  %v566_v23 = vperm.slane %v899_v13, 1  ;;  %v568_v34 = vperm.slane %v899_v13, 3 }
  0xd5   :  { %v362_v28 = vadd.f32 %v361_v24, %v342_v18  ;;  %v372_v33 = vadd.f32 %v1175_v58, %v371_v22  ;;  %v395_v37 = vsel %vm1195_vm4, %v1173_v54, %v391_v26  ;;  %v436_v54 = vld [vmem:[#allocation2 + $0x410] sm:$0xff]  ;;  %688 = vmatpush.msrb.mxu1 %v500_v59  ;;  %v808_v24 = vld [vmem:[#allocation5 + $0x40] sm:$0xff] }
  0xd6   :  { %v400_v43 = vsel %vm1209_vm6, %v399_v21, %v395_v37  ;;  %668 = vmatpush.msrb.mxu0 %v436_v54  ;;  %v809_v21 = vld [vmem:[#allocation5 + $0x48] sm:$0xff] }
  0xd7   :  { %v896_v38 = vmul.f32 -1.442695, %v362_v28  ;;  %v376_v42 = vsel %vm1204_vm5, %v1175_v58, %v372_v33  ;;  %v422_v47 = vmul.f32 %v400_v43, %v65_v32  ;;  %v805_v32 = vld [vmem:[#allocation5 + $0x28] sm:$0xff] }
  0xd8   :  { %v381_v46 = vsel %vm1217_vm7, %v380_v25, %v376_v42  ;;  %689 = vmatmul.f32.vlgmr.msrb.gmra.mxu1 %v897_v36  ;;  %729 = vmatmul.f32.vlgmr.msrb.gmra.mxu3 %v897_v36  ;;  %v803_v36 = vld [vmem:[#allocation5 + $0x18] sm:$0xff] }
  0xd9   :  { %924 = vpow2.f32 %v896_v38  ;;  %v923_v50 = vpop.eup %922  ;;  %v802_v38 = vld [vmem:[#allocation5 + $0x10] sm:$0xff] }
  0xda   :  { %v423_v53 = vmul.f32 %v923_v50, %v381_v46  ;;  %v800_v46 = vld [vmem:[#allocation5] sm:$0xff]  ;;  %v567_v50 = vperm.slane %v899_v13, 2 }
  0xdc   :  { %v424_v58 = vadd.f32 %v423_v53, %v422_v47 }
  0xde   :  { %428 = vst [vmem:[#allocation8] sm:$0x3] %v424_v58 }
  0xdf   :  { %v925_v61 = vpop.eup %924 }
  0xe0   :  { %v406_v62 = vadd.f32 1.0, %v925_v61 }
  0xe2   :  { %926 = vrcp.f32 %v406_v62  ;;  %v418_v2 = vand.u32 2147483648, %v406_v62  ;;  %v416_v4 = vand.u32 2147483647, %v406_v62  ;;  %vm412_vm9 = vweird.f32 %v406_v62 }
  0xe3   :  { %928 = vtanh.f32 %v424_v58 }
  0xe4   :  { %v419_v6 = vor.u32 1.1754944e-38, %v418_v2  ;;  %vm417_vm11 = vcmp.eq.f32.partialorder %v416_v4, 8.507059e+37 }
  0xe8   :  { %v927_v63 = vpop.eup %926 }
  0xe9   :  { %v408_v0 = vmul.f32 %v927_v63, %v406_v62  ;;  %vm413_vm8 = vweird.f32 %v927_v63  ;;  %v929_v39 = vpop.eup %928 }
  0xea   :  { %vm414_vm10 = vmor %vm412_vm9, %vm413_vm8 }
  0xeb   :  { %v409_v1 = vsub.f32 1.0, %v408_v0 }
  0xed   :  { %v410_v3 = vmul.f32 %v927_v63, %v409_v1 }
  0xef   :  { %v411_v5 = vadd.f32 %v927_v63, %v410_v3 }
  0xf1   :  { %v415_v7 = vsel %vm414_vm10, %v927_v63, %v411_v5 }
  0xf2   :  { %v420_v8 = vsel %vm417_vm11, %v419_v6, %v415_v7 }
  0xf3   :  { %v426_v9 = vmul.f32 %v929_v39, %v420_v8 }
  0xf5   :  { %589 = vmatmul.f32.vlgmr.msra.gmra.mxu0 %v426_v9  ;;  %427 = vst [vmem:[#allocation7] sm:$0x3] %v426_v9  ;;  %629 = vmatmul.f32.vlgmr.msra.gmra.mxu2 %v426_v9 }
  0xf6   :  { %820 = vmatpush.msra.mxu0 %v815_v10  ;;  %v898_v10 = vld [vmem:[%s1258_s2 + $0x2] sm:$0x3]  ;;  %s1080_s2 = smov [#allocation8]  }
  0xf7   :  { %s858_s11 = sshll.u32 %s1080_s2, 4  ;;  %s859_s11 = int_to_ptr.vmem [resolvable:$true] %s858_s11 }
  0xf8   :  { %821 = vmatpush.msra.mxu0 %v814_v11 }
  0xfa   :  { %822 = vmatpush.msra.mxu0 %v813_v12 }
  0xfc   :  { %823 = vmatpush.msra.mxu0 %v812_v14 }
  0xfd   :  { %669 = vmatmul.f32.vlgmr.msrb.gmra.mxu0 %v426_v9  ;;  %709 = vmatmul.f32.vlgmr.msrb.gmra.mxu2 %v426_v9 }
  0xfe   :  { %824 = vmatpush.msra.mxu0 %v811_v16 }
 0x100   :  { %825 = vmatpush.msra.mxu0 %v810_v17 }
 0x102   :  { %826 = vmatpush.msra.mxu0 %v809_v21 }
 0x104   :  { %827 = vmatpush.msra.mxu0 %v808_v24 }
 0x106   :  { %828 = vmatpush.msra.mxu0 %v807_v27 }
 0x108   :  { %829 = vmatpush.msra.mxu0 %v806_v30 }
 0x10a   :  { %830 = vmatpush.msra.mxu0 %v805_v32 }
 0x10c   :  { %831 = vmatpush.msra.mxu0 %v804_v35 }
 0x10e   :  { %832 = vmatpush.msra.mxu0 %v803_v36 }
 0x110   :  { %833 = vmatpush.msra.mxu0 %v802_v38 }
 0x112   :  { %834 = vmatpush.msra.mxu0 %v801_v44 }
 0x114   :  { %835 = vmatpush.msra.mxu0 %v800_v46 }
 0x14d   :  { %v610_v19 = vpop.f32.mrf.mxu1 }
 0x153   :  { %v650_v25 = vpop.f32.mrf.mxu3 }
 0x155   :  { %v690_v56 = vpop.f32.mrf.mxu1 }
 0x15b   :  { %v730_v42 = vpop.f32.mrf.mxu3 }
 0x172   :  { %v590_v18 = vpop.f32.mrf.mxu0 }
 0x173   :  { %v591_v20 = vadd.f32 %v590_v18, %v565_v15 }
 0x175   :  { %v611_v22 = vadd.f32 %v610_v19, %v591_v20 }
 0x177   :  { %v900_v26 = vmul.f32 -1.442695, %v611_v22 }
 0x178   :  { %v630_v28 = vpop.f32.mrf.mxu2 }
 0x179   :  { %930 = vpow2.f32 %v900_v26  ;;  %v631_v29 = vadd.f32 %v630_v28, %v566_v23 }
 0x17a   :  { %v670_v51 = vpop.f32.mrf.mxu0 }
 0x17b   :  { %v651_v31 = vadd.f32 %v650_v25, %v631_v29  ;;  %v671_v54 = vadd.f32 %v670_v51, %v567_v50  ;;  %v913_v29 = vld [vmem:[%s1262_s6] ss:$0 sm:$0xff] }
 0x17d   :  { %v901_v33 = vmul.f32 -1.442695, %v651_v31  ;;  %v691_v60 = vadd.f32 %v690_v56, %v671_v54 }
 0x17f   :  { %v931_v37 = vpop.eup %930  ;;  %932 = vpow2.f32 %v901_v33 }
 0x180   :  { %v736_v40 = vadd.f32 1.0, %v931_v37  ;;  %v710_v41 = vpop.f32.mrf.mxu2 }
 0x181   :  { %v711_v43 = vadd.f32 %v710_v41, %v568_v34 }
 0x182   :  { %934 = vrcp.f32 %v736_v40  ;;  %v748_v0 = vand.u32 2147483648, %v736_v40  ;;  %vm742_vm13 = vweird.f32 %v736_v40  ;;  %v746_v2 = vand.u32 2147483647, %v736_v40 }
 0x183   :  { %v731_v45 = vadd.f32 %v730_v42, %v711_v43 }
 0x184   :  { %v749_v7 = vor.u32 1.1754944e-38, %v748_v0  ;;  %vm747_vm1 = vcmp.eq.f32.partialorder %v746_v2, 8.507059e+37 }
 0x185   :  { %v933_v47 = vpop.eup %932  ;;  %v902_v48 = vmul.f32 -1.442695, %v731_v45 }
 0x186   :  { %v755_v49 = vadd.f32 1.0, %v933_v47 }
 0x187   :  { %936 = vpow2.f32 %v902_v48 }
 0x188   :  { %v935_v52 = vpop.eup %934  ;;  %938 = vrcp.f32 %v755_v49  ;;  %v767_v3 = vand.u32 2147483648, %v755_v49  ;;  %v765_v6 = vand.u32 2147483647, %v755_v49  ;;  %vm761_vm0 = vweird.f32 %v755_v49 }
 0x189   :  { %v738_v53 = vmul.f32 %v935_v52, %v736_v40  ;;  %vm743_vm12 = vweird.f32 %v935_v52 }
 0x18a   :  { %vm744_vm14 = vmor %vm742_vm13, %vm743_vm12  ;;  %v768_v9 = vor.u32 1.1754944e-38, %v767_v3  ;;  %vm766_vm3 = vcmp.eq.f32.partialorder %v765_v6, 8.507059e+37 }
 0x18b   :  { %v739_v55 = vsub.f32 1.0, %v738_v53 }
 0x18d   :  { %v937_v57 = vpop.eup %936  ;;  %v740_v58 = vmul.f32 %v935_v52, %v739_v55 }
 0x18e   :  { %v939_v59 = vpop.eup %938  ;;  %v775_v61 = vadd.f32 1.0, %v937_v57 }
 0x18f   :  { %v757_v62 = vmul.f32 %v939_v59, %v755_v49  ;;  %v741_v63 = vadd.f32 %v935_v52, %v740_v58  ;;  %vm762_vm15 = vweird.f32 %v939_v59 }
 0x190   :  { %940 = vrcp.f32 %v775_v61  ;;  %vm763_vm2 = vmor %vm761_vm0, %vm762_vm15  ;;  %v787_v22 = vand.u32 2147483648, %v775_v61  ;;  %vm781_vm5 = vweird.f32 %v775_v61  ;;  %v785_v23 = vand.u32 2147483647, %v775_v61 }
 0x191   :  { %v758_v1 = vsub.f32 1.0, %v757_v62  ;;  %942 = vtanh.f32 %v691_v60  ;;  %v745_v5 = vsel %vm744_vm14, %v935_v52, %v741_v63 }
 0x192   :  { %v750_v11 = vsel %vm747_vm1, %v749_v7, %v745_v5  ;;  %v788_v25 = vor.u32 1.1754944e-38, %v787_v22  ;;  %vm786_vm7 = vcmp.eq.f32.partialorder %v785_v23, 8.507059e+37 }
 0x193   :  { %v759_v4 = vmul.f32 %v939_v59, %v758_v1 }
 0x195   :  { %v760_v39 = vadd.f32 %v939_v59, %v759_v4 }
 0x196   :  { %v941_v8 = vpop.eup %940 }
 0x197   :  { %v764_v12 = vsel %vm763_vm2, %v939_v59, %v760_v39  ;;  %v777_v13 = vmul.f32 %v941_v8, %v775_v61  ;;  %v943_v14 = vpop.eup %942  ;;  %vm782_vm4 = vweird.f32 %v941_v8 }
 0x198   :  { %v769_v15 = vsel %vm766_vm3, %v768_v9, %v764_v12  ;;  %v792_v17 = vmul.f32 %v943_v14, %v750_v11  ;;  %vm783_vm6 = vmor %vm781_vm5, %vm782_vm4 }
 0x199   :  { %v791_v16 = vmul.f32 %v898_v10, %v769_v15  ;;  %v778_v18 = vsub.f32 1.0, %v777_v13 }
 0x19b   :  { %v793_v19 = vadd.f32 %v792_v17, %v791_v16  ;;  %v779_v20 = vmul.f32 %v941_v8, %v778_v18 }
 0x19d   :  { %944 = vtanh.f32 %v793_v19  ;;  %799 = vst [vmem:[#allocation8 + $0x2] sm:$0x3] %v793_v19  ;;  %v780_v21 = vadd.f32 %v941_v8, %v779_v20 }
 0x19e   :  { %866 = dma.vmem_to_hbm [thread:$0]  %s859_s11, 64, %s861_s14, [#allocation9], %s1076_s18, %s1076_s18, %s1081_s15  }
 0x19f   :  { %v784_v24 = vsel %vm783_vm6, %v941_v8, %v780_v21 }
 0x1a0   :  { %v789_v27 = vsel %vm786_vm7, %v788_v25, %v784_v24 }
 0x1a3   :  { %v945_v26 = vpop.eup %944 }
 0x1a4   :  { %v795_v28 = vmul.f32 %v945_v26, %v789_v27 }
 0x1a6   :  { %836 = vmatmul.f32.vlgmr.msra.gmra.mxu0 %v795_v28  ;;  %797 = vst [vmem:[#allocation7 + $0x2] sm:$0x3] %v795_v28 }
 0x1a7   :  { %853 = dma.vmem_to_hbm [thread:$0]  %s846_s17, 64, %s848_s21, [#allocation4], %s1076_s18, %s1076_s18, %s1081_s15  }
 0x223   :  { %v837_v30 = vpop.f32.mrf.mxu0 }
 0x224   :  { %v838_v31 = vadd.f32 %v913_v29, %v837_v30 }
 0x226   :  { %840 = vst [vmem:[#allocation10] sm:$0x3] %v838_v31 }
 0x227   :  { %877 = dma.vmem_to_hbm [thread:$0]  %s873_s5, 32, %s875_s0, [#allocation9]  }
 0x228   :  { %1070 = dma.done.wait [#allocation4], 64  }
 0x229   :  { %1071 = vsyncadd [#allocation4], 4294967232 }
 0x22a   :  { %1072 = dma.done.wait [#allocation9], 96  }
 0x22b   :  { %1073 = vsyncadd [#allocation9], 4294967200 }
 0x22c   :  { %890 = vsyncpa [#allocation3], 1 }
 0x22d   :  { %891 = vsyncpa [#allocation6], 1 }
 0x22e   :  { %892 = vsyncpa [#allocation4], 1 }
 0x22f   :  { %893 = vsyncpa [#allocation9], 1 }

</bundles_post_ra>
